<compile_context>
chip_gen: v7x
topology: tpu7x:2x2x1
jax: 0.10.0
libtpu: 0.0.40
codegen_flags: <defaults>
</compile_context>

<pallas_src>
import jax
import jax.numpy as jnp
from jax import lax
from jax.experimental import pallas as pl
from jax.experimental.pallas import tpu as pltpu

LANES = 128
SUBLANES = 8
TARGET_TILE_BYTES = 4 << 20   # per input per pipeline buffer (~4 MiB)
SMALL_N = 16384               # below this, plain jnp beats kernel launch overhead


def _round_up(x, m):
    return ((x + m - 1) // m) * m


def _num_tc_splits():
    """2 independent TensorCores on v7x (each with its own HBM path); 1 elsewhere."""
    try:
        kind = jax.devices()[0].device_kind.lower()
    except Exception:
        return 1
    return 2 if ("v7" in kind or "7x" in kind) else 1


def _as_rows_of_lanes(x, rows):
    """Free reshape to (rows, 128) when n % 128 == 0; tiny host pad otherwise."""
    flat = x.reshape(-1)
    padded = rows * LANES
    if padded != flat.shape[0]:
        # Rare path (n % 128 != 0): XLA materializes a padded copy here.
        flat = jnp.pad(flat, (0, padded - flat.shape[0]))
    return flat.reshape(rows, LANES)


def _make_kernel(rows, tile_rows, tiles_per_split, mask_needed):
    groups = tile_rows // SUBLANES

    def kernel(v0_ref, v1_ref, t_ref, out_ref):
        c = pl.program_id(0)
        j = pl.program_id(1)

        # Output block is constant across j -> it stays VMEM-resident and acts
        # as the (8, 128) accumulator; written back to HBM once per split.
        @pl.when(j == 0)
        def _init():
            out_ref[...] = jnp.zeros_like(out_ref)

        # astype is a no-op for f32; for bf16 it guarantees f32 accumulation
        # (and a valid VPU lowering on v5e, which has no bf16 VALU).
        v0 = v0_ref[...].astype(jnp.float32)
        v1 = v1_ref[...].astype(jnp.float32)
        t = t_ref[...].astype(jnp.float32)
        prod = (v1 - v0) * t

        if mask_needed:
            # Only emitted when the tile grid does not exactly cover `rows`.
            # Rows past the end (stale DMA buffer contents) are zeroed; a
            # fully-out-of-range tile (clamped in the index_map) masks to 0.
            start = (c * tiles_per_split + j) * tile_rows
            valid = rows - start
            row_ids = lax.broadcasted_iota(jnp.int32, (tile_rows, LANES), 0)
            prod = jnp.where(row_ids < valid, prod, 0.0)

        # Fold the tile into the (8, 128) accumulator: pure sublane-aligned
        # vreg adds, no cross-lane movement, no tile-sized scratch.
        out_ref[...] += prod.reshape(groups, SUBLANES, LANES).sum(axis=0)

    return kernel


def cc_loss(visual_concepts, textual_concepts, topk_indices=None,
            concepts_embeddings_normed=None, output_dict=False):
    """visual_concepts: tuple/list of two [B, K, D] arrays.
    textual_concepts: [B, K, D].  Returns a scalar f32 loss."""
    v0, v1 = visual_concepts[0], visual_concepts[1]
    t = textual_concepts
    B, K, D = v0.shape
    assert v1.shape == (B, K, D) and t.shape == (B, K, D)
    n = B * K * D
    inv_bk = 1.0 / (B * K)

    # Fast path: pallas_call + DMA setup overhead dwarfs tiny workloads.
    if n < SMALL_N:
        loss = jnp.sum((v1.astype(jnp.float32) - v0.astype(jnp.float32))
                       * t.astype(jnp.float32)) * inv_bk
        return {'contrastive_loss': loss} if output_dict else loss

    itemsize = max(v0.dtype.itemsize, v1.dtype.itemsize, t.dtype.itemsize)
    rows = pl.cdiv(n, LANES)

    num_splits = _num_tc_splits()
    if rows < num_splits * SUBLANES:
        num_splits = 1

    # Tile sizing: ~4 MiB per input per buffer, tiles chosen so the grid
    # covers `rows` with at most one partial tile (handled by the in-kernel
    # mask) — no host-side rounding of the data itself.
    max_tile_rows = max(SUBLANES,
                        (TARGET_TILE_BYTES // (LANES * itemsize))
                        // SUBLANES * SUBLANES)
    total_tiles = _round_up(pl.cdiv(rows, max_tile_rows), num_splits)
    tile_rows = _round_up(pl.cdiv(rows, total_tiles), SUBLANES)
    tiles_per_split = total_tiles // num_splits
    last_block = pl.cdiv(rows, tile_rows) - 1        # last block starting in-bounds
    mask_needed = (total_tiles * tile_rows != rows)

    v0_2d = _as_rows_of_lanes(v0, rows)
    v1_2d = _as_rows_of_lanes(v1, rows)
    t_2d = _as_rows_of_lanes(t, rows)

    def in_map(c, j):
        # Clamp so a (rare) fully-out-of-range tile re-reads an in-bounds block
        # (its contribution is masked to zero in the kernel).
        return (jnp.minimum(c * tiles_per_split + j, last_block), 0)

    in_spec = pl.BlockSpec((tile_rows, LANES), in_map)
    out_spec = pl.BlockSpec((SUBLANES, LANES), lambda c, j: (c, 0))

    kernel = _make_kernel(rows, tile_rows, tiles_per_split, mask_needed)

    tile_bytes = tile_rows * LANES * itemsize
    # 3 inputs x 2 buffers + headroom for elementwise temporaries; stays well
    # under v7x's 64 MiB per-core VMEM.
    vmem_limit = int(min(3 * 2 * tile_bytes + (16 << 20), 56 << 20))

    out = pl.pallas_call(
        kernel,
        out_shape=jax.ShapeDtypeStruct((num_splits * SUBLANES, LANES),
                                       jnp.float32),
        grid_spec=pltpu.PrefetchScalarGridSpec(
            num_scalar_prefetch=0,
            grid=(num_splits, tiles_per_split),
            in_specs=[in_spec, in_spec, in_spec],
            out_specs=out_spec,
        ),
        compiler_params=pltpu.CompilerParams(
            dimension_semantics=("parallel", "arbitrary"),
            vmem_limit_bytes=vmem_limit,
        ),
        cost_estimate=pl.CostEstimate(
            flops=3 * n,
            transcendentals=0,
            bytes_accessed=rows * LANES * (v0.dtype.itemsize
                                           + v1.dtype.itemsize
                                           + t.dtype.itemsize)
                           + num_splits * SUBLANES * LANES * 4,
        ),
    )(v0_2d, v1_2d, t_2d)

    # Tiny (splits*8, 128) partial-sum slab; reduce + normalize by TRUE B*K.
    loss = jnp.sum(out) * inv_bk
    return {'contrastive_loss': loss} if output_dict else loss


def _reference(visual_concepts, textual_concepts):
    v0 = visual_concepts[0].astype(jnp.float32)
    v1 = visual_concepts[1].astype(jnp.float32)
    t = textual_concepts.astype(jnp.float32)
    e0 = jnp.einsum('bkd,bkd->bk', v0, t)
    e1 = jnp.einsum('bkd,bkd->bk', v1, t)
    return -e0.mean() + e1.mean()


if __name__ == "__main__":
    key = jax.random.PRNGKey(0)

    cases = [
        ((2, 8, 32), jnp.float32),      # tiny -> plain-jnp fast path
        ((4, 16, 512), jnp.float32),    # aligned -> kernel, exact tiling
        ((5, 13, 384), jnp.float32),    # ragged rows -> kernel, masked tail
        ((8, 66, 33), jnp.float32),     # n % 128 != 0 -> rare padded path
        ((4, 16, 512), jnp.bfloat16),   # bf16 streaming, f32 accumulation
    ]

    ok = True
    for shape, dtype in cases:
        key, k0, k1, k2 = jax.random.split(key, 4)
        v0 = jax.random.normal(k0, shape, dtype=jnp.float32).astype(dtype)
        v1 = jax.random.normal(k1, shape, dtype=jnp.float32).astype(dtype)
        txt = jax.random.normal(k2, shape, dtype=jnp.float32).astype(dtype)

        # Unused-by-forward inputs (kept for signature parity with the module).
        topk_indices = jnp.zeros(shape[:2], dtype=jnp.int32)
        concepts_embeddings_normed = jnp.zeros(shape[1:], dtype=jnp.float32)

        loss = cc_loss((v0, v1), txt, topk_indices, concepts_embeddings_normed)
        loss = jax.block_until_ready(loss)

        ref = _reference((v0, v1), txt)
        if not jnp.allclose(loss, ref, atol=2e-3, rtol=2e-3):
            ok = False
            print("MISMATCH", shape, str(dtype), float(loss), float(ref))

    assert ok, "kernel output mismatched reference"
    print("KERNEL_OK")
</pallas_src>

<mosaic_0001>
module attributes {stable_mosaic.version = 11 : i64} {
  func.func @kernel(%arg0: i32, %arg1: i32, %arg2: memref<256x128xf32, #tpu.memory_space<vmem>>, %arg3: memref<256x128xf32, #tpu.memory_space<vmem>>, %arg4: memref<256x128xf32, #tpu.memory_space<vmem>>, %arg5: memref<8x128xf32, #tpu.memory_space<vmem>>) attributes {dimension_semantics = [#tpu.dimension_semantics<parallel>, #tpu.dimension_semantics<arbitrary>], iteration_bounds = array<i64: 1, 1>, scalar_prefetch = 0 : i64, scratch_operands = 0 : i64, tpu.core_type = #tpu.core_type<tc>, window_params = [{transform_indices = @transform_0, window_bounds = array<i64: 256, 128>}, {transform_indices = @transform_1, window_bounds = array<i64: 256, 128>}, {transform_indices = @transform_2, window_bounds = array<i64: 256, 128>}, {transform_indices = @transform_3, window_bounds = array<i64: 8, 128>}]} {
    %c0_i32 = arith.constant 0 : i32
    %0 = arith.cmpi eq, %arg1, %c0_i32 : i32
    %1 = arith.extui %0 : i1 to i32
    %c0_i32_0 = arith.constant 0 : i32
    %2 = arith.cmpi ne, %1, %c0_i32_0 : i32
    scf.if %2 {
      %cst_10 = arith.constant 0.000000e+00 : f32
      %13 = vector.broadcast %cst_10 : f32 to vector<8x128xf32>
      %c0_11 = arith.constant 0 : index
      %c0_12 = arith.constant 0 : index
      %14 = vector.load %arg5[%c0_11, %c0_12] : memref<8x128xf32, #tpu.memory_space<vmem>>, vector<8x128xf32>
      tpu.vector_store %arg5[%c0_11, %c0_12], %13 {strides = array<i32>} : memref<8x128xf32, #tpu.memory_space<vmem>>, vector<8x128xf32>,
    } else {
    }
    %c0 = arith.constant 0 : index
    %c0_1 = arith.constant 0 : index
    %3 = vector.load %arg2[%c0, %c0_1] : memref<256x128xf32, #tpu.memory_space<vmem>>, vector<256x128xf32>
    %c0_2 = arith.constant 0 : index
    %c0_3 = arith.constant 0 : index
    %4 = vector.load %arg3[%c0_2, %c0_3] : memref<256x128xf32, #tpu.memory_space<vmem>>, vector<256x128xf32>
    %c0_4 = arith.constant 0 : index
    %c0_5 = arith.constant 0 : index
    %5 = vector.load %arg4[%c0_4, %c0_5] : memref<256x128xf32, #tpu.memory_space<vmem>>, vector<256x128xf32>
    %6 = arith.subf %4, %3 : vector<256x128xf32>
    %7 = arith.mulf %6, %5 : vector<256x128xf32>
    %c0_6 = arith.constant 0 : index
    %c0_7 = arith.constant 0 : index
    %8 = vector.load %arg5[%c0_6, %c0_7] : memref<8x128xf32, #tpu.memory_space<vmem>>, vector<8x128xf32>
    %9 = vector.shape_cast %7 : vector<256x128xf32> to vector<32x8x128xf32>
    %cst = arith.constant dense<0.000000e+00> : vector<8x128xf32>
    %10 = vector.multi_reduction <add>, %9, %cst [0] : vector<32x8x128xf32> to vector<8x128xf32>
    %11 = arith.addf %8, %10 : vector<8x128xf32>
    %c0_8 = arith.constant 0 : index
    %c0_9 = arith.constant 0 : index
    %12 = vector.load %arg5[%c0_8, %c0_9] : memref<8x128xf32, #tpu.memory_space<vmem>>, vector<8x128xf32>
    tpu.vector_store %arg5[%c0_8, %c0_9], %11 {strides = array<i32>} : memref<8x128xf32, #tpu.memory_space<vmem>>, vector<8x128xf32>,
    return
  }
  func.func @transform_0(%arg0: i32, %arg1: i32) -> (i32, i32) {
    %c1_i32 = arith.constant 1 : i32
    %0 = arith.muli %arg0, %c1_i32 : i32
    %1 = arith.addi %0, %arg1 : i32
    %c0_i32 = arith.constant 0 : i32
    %2 = arith.minsi %1, %c0_i32 : i32
    %c0_i32_0 = arith.constant 0 : i32
    %c0_i32_1 = arith.constant 0 : i32
    return %2, %c0_i32_0 : i32, i32
  }
  func.func @transform_1(%arg0: i32, %arg1: i32) -> (i32, i32) {
    %c1_i32 = arith.constant 1 : i32
    %0 = arith.muli %arg0, %c1_i32 : i32
    %1 = arith.addi %0, %arg1 : i32
    %c0_i32 = arith.constant 0 : i32
    %2 = arith.minsi %1, %c0_i32 : i32
    %c0_i32_0 = arith.constant 0 : i32
    %c0_i32_1 = arith.constant 0 : i32
    return %2, %c0_i32_0 : i32, i32
  }
  func.func @transform_2(%arg0: i32, %arg1: i32) -> (i32, i32) {
    %c1_i32 = arith.constant 1 : i32
    %0 = arith.muli %arg0, %c1_i32 : i32
    %1 = arith.addi %0, %arg1 : i32
    %c0_i32 = arith.constant 0 : i32
    %2 = arith.minsi %1, %c0_i32 : i32
    %c0_i32_0 = arith.constant 0 : i32
    %c0_i32_1 = arith.constant 0 : i32
    return %2, %c0_i32_0 : i32, i32
  }
  func.func @transform_3(%arg0: i32, %arg1: i32) -> (i32, i32) {
    %c0_i32 = arith.constant 0 : i32
    %c0_i32_0 = arith.constant 0 : i32
    return %arg0, %c0_i32 : i32, i32
  }
}

</mosaic_0001>

<bundles_post_ra>
// kernel: tpu_custom_call.1
= control target key start
LH: loop header
LB: loop body
LE: loop exit
PB: predicated region body
PF: predicated region fallthrough
CT: control target
= control target key end

     0   :  { %8 = vsyncpa [#allocation3], 0  ;;  %s498_s0 = inlined_call_operand.hbm [shape: f32[256,128], index: 0, kind: input, shape index: {}]   ;;  %s499_s1 = inlined_call_operand.hbm [shape: f32[256,128], index: 1, kind: input, shape index: {}]   ;;  %s500_s2 = inlined_call_operand.hbm [shape: f32[256,128], index: 2, kind: input, shape index: {}]   ;;  %s501_s3 = inlined_call_operand.hbm [shape: f32[8,128], index: 3, kind: output, shape index: {}]  }
   0x1   :  { %9 = vsyncpa [#allocation6], 0 }
   0x2   :  { %10 = vsyncpa [#allocation4], 0  ;;  %s408_s12 = smov [#allocation5]   ;;  %s409_s14 = smov [#allocation2]  }
   0x3   :  { %s40_s13 = sshll.u32 %s408_s12, 4  ;;  %s22_s15 = sshll.u32 %s409_s14, 4  ;;  %s41_s13 = int_to_ptr.vmem [resolvable:$true] %s40_s13  ;;  %s434_s15 = int_to_ptr.vmem [resolvable:$true] %s22_s15 }
   0x4   :  { %s314_s18 = scalar_lea.hbm %s499_s1, 4096 }
   0x5   :  { %p315_p0 = scmp.ne.s32.totalorder %s499_s1, %s314_s18  ;;  %p318_p1 = scmp.lt.u32.totalorder %s314_s18, %s499_s1 }
   0x7   :  { %p320_p2 = pnand %p318_p1, %p315_p0 }
   0x9   :  { %323 = shalt.err (!%p320_p2)
}
   0xa   :  { %s324_s23 = scalar_lea.vmem %s41_s13, 4096  ;;  %p329_p4 = scmp.lt.s32.totalorder %s41_s13, %s41_s13 }
   0xb   :  { %p325_p3 = scmp.ne.s32.totalorder %s41_s13, %s324_s23  ;;  %p330_p5 = scmp.lt.s32.totalorder %s324_s23, %s324_s23 }
   0xd   :  { %p331_p6 = por %p330_p5, %p329_p4 }
   0xf   :  { %p332_p7 = pnand %p331_p6, %p325_p3 }
  0x11   :  { %335 = shalt.err (!%p332_p7)
}
  0x12   :  { %s410_s24 = smov 128   ;;  %s411_s25 = smov 8  }
  0x13   :  { %46 = dma.hbm_to_vmem [thread:$0]  %s499_s1, 4096, %s41_s13, [#allocation6], %s410_s24, %s410_s24, %s411_s25  }
  0x14   :  { %s336_s30 = scalar_lea.hbm %s498_s0, 4096 }
  0x15   :  { %p337_p8 = scmp.ne.s32.totalorder %s498_s0, %s336_s30  ;;  %p340_p9 = scmp.lt.u32.totalorder %s336_s30, %s498_s0 }
  0x17   :  { %p342_p10 = pnand %p340_p9, %p337_p8 }
  0x19   :  { %345 = shalt.err (!%p342_p10)
}
  0x1a   :  { %s346_s8 = scalar_lea.vmem %s434_s15, 4096  ;;  %p351_p12 = scmp.lt.s32.totalorder %s434_s15, %s434_s15 }
  0x1b   :  { %p347_p11 = scmp.ne.s32.totalorder %s434_s15, %s346_s8  ;;  %p352_p13 = scmp.lt.s32.totalorder %s346_s8, %s346_s8 }
  0x1d   :  { %p353_p0 = por %p352_p13, %p351_p12 }
  0x1f   :  { %p354_p1 = pnand %p353_p0, %p347_p11 }
  0x21   :  { %357 = shalt.err (!%p354_p1)
}
  0x22   :  { %28 = dma.hbm_to_vmem [thread:$0]  %s498_s0, 4096, %s434_s15, [#allocation3], %s410_s24, %s410_s24, %s411_s25  }
  0x23   :  { %s412_s10 = smov [#allocation7]   ;;  %s358_s14 = scalar_lea.hbm %s500_s2, 4096 }
  0x24   :  { %s58_s11 = sshll.u32 %s412_s10, 4  ;;  %p359_p2 = scmp.ne.s32.totalorder %s500_s2, %s358_s14  ;;  %s59_s11 = int_to_ptr.vmem [resolvable:$true] %s58_s11 }
  0x25   :  { %p362_p3 = scmp.lt.u32.totalorder %s358_s14, %s500_s2 }
  0x27   :  { %p364_p4 = pnand %p362_p3, %p359_p2 }
  0x29   :  { %367 = shalt.err (!%p364_p4)
}
  0x2a   :  { %s368_s20 = scalar_lea.vmem %s59_s11, 4096  ;;  %p373_p6 = scmp.lt.s32.totalorder %s59_s11, %s59_s11 }
  0x2b   :  { %p369_p5 = scmp.ne.s32.totalorder %s59_s11, %s368_s20  ;;  %p374_p7 = scmp.lt.s32.totalorder %s368_s20, %s368_s20 }
  0x2d   :  { %p375_p8 = por %p374_p7, %p373_p6 }
  0x2f   :  { %p376_p9 = pnand %p375_p8, %p369_p5 }
  0x31   :  { %379 = shalt.err (!%p376_p9)
}
  0x32   :  { %64 = dma.hbm_to_vmem [thread:$0]  %s500_s2, 4096, %s59_s11, [#allocation6], %s410_s24, %s410_s24, %s411_s25  }
  0x33   :  { %402 = dma.done.wait [#allocation3], 4096  }
  0x34   :  { %403 = vsyncadd [#allocation3], 4294963200 }
  0x35   :  { %404 = dma.done.wait [#allocation6], 8192  }
  0x36   :  { %405 = vsyncadd [#allocation6], 4294959104  ;;  %v91_v0 = vld [vmem:[#allocation2] sm:$0xff]  ;;  %v92_v1 = vld [vmem:[#allocation2 + $0x8] sm:$0xff]  ;;  %s413_s2 = smov [#allocation8]  }
  0x37   :  { %v123_v2 = vld [vmem:[#allocation5] sm:$0xff]  ;;  %v124_v3 = vld [vmem:[#allocation5 + $0x8] sm:$0xff]  ;;  %v93_v4 = vld [vmem:[#allocation2 + $0x10] sm:$0xff]  ;;  %s291_s21 = sshll.u32 %s413_s2, 4  ;;  %s292_s21 = int_to_ptr.vmem [resolvable:$true] %s291_s21 }
  0x38   :  { %v125_v5 = vld [vmem:[#allocation5 + $0x10] sm:$0xff]  ;;  %v94_v6 = vld [vmem:[#allocation2 + $0x18] sm:$0xff]  ;;  %v187_v8 = vsub.f32 %v123_v2, %v91_v0  ;;  %v188_v9 = vsub.f32 %v124_v3, %v92_v1  ;;  %v95_v10 = vld [vmem:[#allocation2 + $0x20] sm:$0xff]  ;;  %s380_s22 = scalar_lea.vmem %s292_s21, 128  ;;  %p385_p11 = scmp.lt.s32.totalorder %s292_s21, %s292_s21 }
  0x39   :  { %v126_v7 = vld [vmem:[#allocation5 + $0x18] sm:$0xff]  ;;  %v127_v11 = vld [vmem:[#allocation5 + $0x20] sm:$0xff]  ;;  %v189_v12 = vsub.f32 %v125_v5, %v93_v4  ;;  %v96_v13 = vld [vmem:[#allocation2 + $0x28] sm:$0xff]  ;;  %p381_p10 = scmp.ne.s32.totalorder %s292_s21, %s380_s22  ;;  %p386_p12 = scmp.lt.s32.totalorder %s380_s22, %s380_s22 }
  0x3a   :  { %v190_v14 = vsub.f32 %v126_v7, %v94_v6  ;;  %v128_v15 = vld [vmem:[#allocation5 + $0x28] sm:$0xff]  ;;  %v155_v16 = vld [vmem:[#allocation7] sm:$0xff]  ;;  %v157_v18 = vld [vmem:[#allocation7 + $0x10] sm:$0xff]  ;;  %v191_v20 = vsub.f32 %v127_v11, %v95_v10 }
  0x3b   :  { %v156_v17 = vld [vmem:[#allocation7 + $0x8] sm:$0xff]  ;;  %v158_v19 = vld [vmem:[#allocation7 + $0x18] sm:$0xff]  ;;  %v219_v21 = vmul.f32 %v187_v8, %v155_v16  ;;  %v97_v23 = vld [vmem:[#allocation2 + $0x30] sm:$0xff]  ;;  %v221_v26 = vmul.f32 %v189_v12, %v157_v18  ;;  %v192_v27 = vsub.f32 %v128_v15, %v96_v13  ;;  %p387_p13 = por %p386_p12, %p385_p11 }
  0x3c   :  { %v220_v22 = vmul.f32 %v188_v9, %v156_v17  ;;  %v129_v24 = vld [vmem:[#allocation5 + $0x30] sm:$0xff]  ;;  %v159_v25 = vld [vmem:[#allocation7 + $0x20] sm:$0xff]  ;;  %v222_v28 = vmul.f32 %v190_v14, %v158_v19  ;;  %v98_v30 = vld [vmem:[#allocation2 + $0x38] sm:$0xff] }
  0x3d   :  { %v130_v31 = vld [vmem:[#allocation5 + $0x38] sm:$0xff]  ;;  %v160_v32 = vld [vmem:[#allocation7 + $0x28] sm:$0xff]  ;;  %v193_v33 = vsub.f32 %v129_v24, %v97_v23  ;;  %v223_v34 = vmul.f32 %v191_v20, %v159_v25  ;;  %v99_v36 = vld [vmem:[#allocation2 + $0x40] sm:$0xff]  ;;  %p388_p0 = pnand %p387_p13, %p381_p10 }
  0x3e   :  { %v252_v29 = vadd.f32 %v220_v22, %v219_v21  ;;  %v131_v37 = vld [vmem:[#allocation5 + $0x40] sm:$0xff]  ;;  %v161_v38 = vld [vmem:[#allocation7 + $0x30] sm:$0xff]  ;;  %v194_v39 = vsub.f32 %v130_v31, %v98_v30  ;;  %v224_v40 = vmul.f32 %v192_v27, %v160_v32  ;;  %v100_v42 = vld [vmem:[#allocation2 + $0x48] sm:$0xff] }
  0x3f   :  { %v132_v43 = vld [vmem:[#allocation5 + $0x48] sm:$0xff]  ;;  %v162_v44 = vld [vmem:[#allocation7 + $0x38] sm:$0xff]  ;;  %v195_v45 = vsub.f32 %v131_v37, %v99_v36  ;;  %v225_v46 = vmul.f32 %v193_v33, %v161_v38  ;;  %v101_v48 = vld [vmem:[#allocation2 + $0x50] sm:$0xff] }
  0x40   :  { %v253_v35 = vadd.f32 %v252_v29, %v221_v26  ;;  %v133_v49 = vld [vmem:[#allocation5 + $0x50] sm:$0xff]  ;;  %v163_v50 = vld [vmem:[#allocation7 + $0x40] sm:$0xff]  ;;  %v196_v51 = vsub.f32 %v132_v43, %v100_v42  ;;  %v226_v52 = vmul.f32 %v194_v39, %v162_v44  ;;  %v102_v54 = vld [vmem:[#allocation2 + $0x58] sm:$0xff] }
  0x41   :  { %v134_v55 = vld [vmem:[#allocation5 + $0x58] sm:$0xff]  ;;  %v164_v56 = vld [vmem:[#allocation7 + $0x48] sm:$0xff]  ;;  %v197_v57 = vsub.f32 %v133_v49, %v101_v48  ;;  %v227_v58 = vmul.f32 %v195_v45, %v163_v50  ;;  %v103_v60 = vld [vmem:[#allocation2 + $0x60] sm:$0xff] }
  0x42   :  { %v254_v41 = vadd.f32 %v253_v35, %v222_v28  ;;  %v135_v61 = vld [vmem:[#allocation5 + $0x60] sm:$0xff]  ;;  %v165_v62 = vld [vmem:[#allocation7 + $0x50] sm:$0xff]  ;;  %v198_v63 = vsub.f32 %v134_v55, %v102_v54  ;;  %v228_v0 = vmul.f32 %v196_v51, %v164_v56  ;;  %v104_v2 = vld [vmem:[#allocation2 + $0x68] sm:$0xff] }
  0x43   :  { %v136_v3 = vld [vmem:[#allocation5 + $0x68] sm:$0xff]  ;;  %v166_v4 = vld [vmem:[#allocation7 + $0x58] sm:$0xff]  ;;  %v199_v5 = vsub.f32 %v135_v61, %v103_v60  ;;  %v229_v6 = vmul.f32 %v197_v57, %v165_v62  ;;  %v105_v8 = vld [vmem:[#allocation2 + $0x70] sm:$0xff] }
  0x44   :  { %v255_v47 = vadd.f32 %v254_v41, %v223_v34  ;;  %v137_v9 = vld [vmem:[#allocation5 + $0x70] sm:$0xff]  ;;  %v167_v10 = vld [vmem:[#allocation7 + $0x60] sm:$0xff]  ;;  %v200_v11 = vsub.f32 %v136_v3, %v104_v2  ;;  %v230_v12 = vmul.f32 %v198_v63, %v166_v4  ;;  %v106_v14 = vld [vmem:[#allocation2 + $0x78] sm:$0xff] }
  0x45   :  { %v138_v15 = vld [vmem:[#allocation5 + $0x78] sm:$0xff]  ;;  %v168_v16 = vld [vmem:[#allocation7 + $0x68] sm:$0xff]  ;;  %v201_v17 = vsub.f32 %v137_v9, %v105_v8  ;;  %v231_v18 = vmul.f32 %v199_v5, %v167_v10  ;;  %v107_v20 = vld [vmem:[#allocation2 + $0x80] sm:$0xff] }
  0x46   :  { %v256_v53 = vadd.f32 %v255_v47, %v224_v40  ;;  %v139_v21 = vld [vmem:[#allocation5 + $0x80] sm:$0xff]  ;;  %v169_v22 = vld [vmem:[#allocation7 + $0x70] sm:$0xff]  ;;  %v202_v23 = vsub.f32 %v138_v15, %v106_v14  ;;  %v232_v24 = vmul.f32 %v200_v11, %v168_v16  ;;  %v108_v26 = vld [vmem:[#allocation2 + $0x88] sm:$0xff] }
  0x47   :  { %v140_v27 = vld [vmem:[#allocation5 + $0x88] sm:$0xff]  ;;  %v170_v28 = vld [vmem:[#allocation7 + $0x78] sm:$0xff]  ;;  %v203_v29 = vsub.f32 %v139_v21, %v107_v20  ;;  %v233_v30 = vmul.f32 %v201_v17, %v169_v22  ;;  %v109_v32 = vld [vmem:[#allocation2 + $0x90] sm:$0xff] }
  0x48   :  { %v257_v59 = vadd.f32 %v256_v53, %v225_v46  ;;  %v141_v33 = vld [vmem:[#allocation5 + $0x90] sm:$0xff]  ;;  %v171_v34 = vld [vmem:[#allocation7 + $0x80] sm:$0xff]  ;;  %v204_v35 = vsub.f32 %v140_v27, %v108_v26  ;;  %v234_v36 = vmul.f32 %v202_v23, %v170_v28  ;;  %v110_v38 = vld [vmem:[#allocation2 + $0x98] sm:$0xff] }
  0x49   :  { %v142_v39 = vld [vmem:[#allocation5 + $0x98] sm:$0xff]  ;;  %v172_v40 = vld [vmem:[#allocation7 + $0x88] sm:$0xff]  ;;  %v205_v41 = vsub.f32 %v141_v33, %v109_v32  ;;  %v235_v42 = vmul.f32 %v203_v29, %v171_v34  ;;  %v111_v44 = vld [vmem:[#allocation2 + $0xa0] sm:$0xff] }
  0x4a   :  { %v258_v1 = vadd.f32 %v257_v59, %v226_v52  ;;  %v143_v45 = vld [vmem:[#allocation5 + $0xa0] sm:$0xff]  ;;  %v173_v46 = vld [vmem:[#allocation7 + $0x90] sm:$0xff]  ;;  %v206_v47 = vsub.f32 %v142_v39, %v110_v38  ;;  %v236_v48 = vmul.f32 %v204_v35, %v172_v40  ;;  %v112_v50 = vld [vmem:[#allocation2 + $0xa8] sm:$0xff] }
  0x4b   :  { %v144_v51 = vld [vmem:[#allocation5 + $0xa8] sm:$0xff]  ;;  %v174_v52 = vld [vmem:[#allocation7 + $0x98] sm:$0xff]  ;;  %v207_v53 = vsub.f32 %v143_v45, %v111_v44  ;;  %v237_v54 = vmul.f32 %v205_v41, %v173_v46  ;;  %v113_v56 = vld [vmem:[#allocation2 + $0xb0] sm:$0xff] }
  0x4c   :  { %v259_v7 = vadd.f32 %v258_v1, %v227_v58  ;;  %v145_v57 = vld [vmem:[#allocation5 + $0xb0] sm:$0xff]  ;;  %v175_v58 = vld [vmem:[#allocation7 + $0xa0] sm:$0xff]  ;;  %v208_v59 = vsub.f32 %v144_v51, %v112_v50  ;;  %v238_v60 = vmul.f32 %v206_v47, %v174_v52  ;;  %v114_v62 = vld [vmem:[#allocation2 + $0xb8] sm:$0xff] }
  0x4d   :  { %v146_v63 = vld [vmem:[#allocation5 + $0xb8] sm:$0xff]  ;;  %v209_v1 = vsub.f32 %v145_v57, %v113_v56  ;;  %v239_v2 = vmul.f32 %v207_v53, %v175_v58  ;;  %v115_v4 = vld [vmem:[#allocation2 + $0xc0] sm:$0xff]  ;;  %v116_v10 = vld [vmem:[#allocation2 + $0xc8] sm:$0xff] }
  0x4e   :  { %v260_v13 = vadd.f32 %v259_v7, %v228_v0  ;;  %v176_v0 = vld [vmem:[#allocation7 + $0xa8] sm:$0xff]  ;;  %v147_v5 = vld [vmem:[#allocation5 + $0xc0] sm:$0xff]  ;;  %v210_v7 = vsub.f32 %v146_v63, %v114_v62  ;;  %v117_v16 = vld [vmem:[#allocation2 + $0xd0] sm:$0xff] }
  0x4f   :  { %v240_v8 = vmul.f32 %v208_v59, %v176_v0  ;;  %v148_v11 = vld [vmem:[#allocation5 + $0xc8] sm:$0xff]  ;;  %v149_v17 = vld [vmem:[#allocation5 + $0xd0] sm:$0xff]  ;;  %v118_v22 = vld [vmem:[#allocation2 + $0xd8] sm:$0xff] }
  0x50   :  { %v261_v19 = vadd.f32 %v260_v13, %v229_v6  ;;  %v177_v6 = vld [vmem:[#allocation7 + $0xb0] sm:$0xff]  ;;  %v211_v13 = vsub.f32 %v147_v5, %v115_v4  ;;  %v150_v23 = vld [vmem:[#allocation5 + $0xd8] sm:$0xff]  ;;  %v119_v28 = vld [vmem:[#allocation2 + $0xe0] sm:$0xff] }
  0x51   :  { %v241_v14 = vmul.f32 %v209_v1, %v177_v6  ;;  %v151_v29 = vld [vmem:[#allocation5 + $0xe0] sm:$0xff]  ;;  %v120_v34 = vld [vmem:[#allocation2 + $0xe8] sm:$0xff]  ;;  %v121_v40 = vld [vmem:[#allocation2 + $0xf0] sm:$0xff] }
  0x52   :  { %v262_v25 = vadd.f32 %v261_v19, %v230_v12  ;;  %v178_v12 = vld [vmem:[#allocation7 + $0xb8] sm:$0xff]  ;;  %v212_v19 = vsub.f32 %v148_v11, %v116_v10  ;;  %v152_v35 = vld [vmem:[#allocation5 + $0xe8] sm:$0xff]  ;;  %v153_v41 = vld [vmem:[#allocation5 + $0xf0] sm:$0xff] }
  0x53   :  { %v242_v20 = vmul.f32 %v210_v7, %v178_v12  ;;  %v122_v46 = vld [vmem:[#allocation2 + $0xf8] sm:$0xff]  ;;  %v185_v52 = vld [vmem:[#allocation7 + $0xf0] sm:$0xff] }
  0x54   :  { %v263_v31 = vadd.f32 %v262_v25, %v231_v18  ;;  %v179_v18 = vld [vmem:[#allocation7 + $0xc0] sm:$0xff]  ;;  %v213_v25 = vsub.f32 %v149_v17, %v117_v16  ;;  %v154_v47 = vld [vmem:[#allocation5 + $0xf8] sm:$0xff] }
  0x55   :  { %v243_v26 = vmul.f32 %v211_v13, %v179_v18  ;;  %v218_v53 = vsub.f32 %v154_v47, %v122_v46  ;;  %v186_v56 = vld [vmem:[#allocation7 + $0xf8] sm:$0xff] }
  0x56   :  { %v264_v37 = vadd.f32 %v263_v31, %v232_v24  ;;  %v180_v24 = vld [vmem:[#allocation7 + $0xc8] sm:$0xff]  ;;  %v214_v31 = vsub.f32 %v150_v23, %v118_v22 }
  0x57   :  { %v244_v32 = vmul.f32 %v212_v19, %v180_v24  ;;  %v250_v59 = vmul.f32 %v218_v53, %v186_v56 }
  0x58   :  { %v265_v43 = vadd.f32 %v264_v37, %v233_v30  ;;  %v181_v30 = vld [vmem:[#allocation7 + $0xd0] sm:$0xff]  ;;  %v215_v37 = vsub.f32 %v151_v29, %v119_v28 }
  0x59   :  { %v245_v38 = vmul.f32 %v213_v25, %v181_v30 }
  0x5a   :  { %v266_v49 = vadd.f32 %v265_v43, %v234_v36  ;;  %v182_v36 = vld [vmem:[#allocation7 + $0xd8] sm:$0xff]  ;;  %v216_v43 = vsub.f32 %v152_v35, %v120_v34 }
  0x5b   :  { %v246_v44 = vmul.f32 %v214_v31, %v182_v36 }
  0x5c   :  { %v267_v55 = vadd.f32 %v266_v49, %v235_v42  ;;  %v183_v42 = vld [vmem:[#allocation7 + $0xe0] sm:$0xff]  ;;  %v217_v49 = vsub.f32 %v153_v41, %v121_v40 }
  0x5d   :  { %v247_v50 = vmul.f32 %v215_v37, %v183_v42 }
  0x5e   :  { %v268_v61 = vadd.f32 %v267_v55, %v236_v48  ;;  %v184_v48 = vld [vmem:[#allocation7 + $0xe8] sm:$0xff]  ;;  %v249_v57 = vmul.f32 %v217_v49, %v185_v52 }
  0x60   :  { %v269_v3 = vadd.f32 %v268_v61, %v237_v54  ;;  %v248_v54 = vmul.f32 %v216_v43, %v184_v48 }
  0x62   :  { %v270_v9 = vadd.f32 %v269_v3, %v238_v60 }
  0x64   :  { %v271_v15 = vadd.f32 %v270_v9, %v239_v2 }
  0x66   :  { %v272_v21 = vadd.f32 %v271_v15, %v240_v8 }
  0x68   :  { %v273_v27 = vadd.f32 %v272_v21, %v241_v14 }
  0x6a   :  { %v274_v33 = vadd.f32 %v273_v27, %v242_v20 }
  0x6c   :  { %v275_v39 = vadd.f32 %v274_v33, %v243_v26 }
  0x6e   :  { %v276_v45 = vadd.f32 %v275_v39, %v244_v32 }
  0x70   :  { %v277_v51 = vadd.f32 %v276_v45, %v245_v38 }
  0x72   :  { %v278_v55 = vadd.f32 %v277_v51, %v246_v44 }
  0x74   :  { %v279_v58 = vadd.f32 %v278_v55, %v247_v50 }
  0x76   :  { %v280_v60 = vadd.f32 %v279_v58, %v248_v54 }
  0x78   :  { %v281_v61 = vadd.f32 %v280_v60, %v249_v57 }
  0x7a   :  { %v282_v62 = vadd.f32 %v281_v61, %v250_v59 }
  0x7c   :  { %284 = vst [vmem:[#allocation8] sm:$0xff] %v282_v62 }
  0x7d   :  { %391 = shalt.err (!%p388_p0)
}
  0x7e   :  { %s392_s25 = scalar_lea.hbm %s501_s3, 128 }
  0x7f   :  { %p393_p1 = scmp.ne.s32.totalorder %s501_s3, %s392_s25  ;;  %p396_p2 = scmp.lt.u32.totalorder %s392_s25, %s501_s3 }
  0x81   :  { %p398_p3 = pnand %p396_p2, %p393_p1 }
  0x83   :  { %401 = shalt.err (!%p398_p3)
}
  0x84   :  { %294 = dma.vmem_to_hbm [thread:$0]  %s292_s21, 128, %s501_s3, [#allocation4]  }
  0x85   :  { %406 = dma.done.wait [#allocation4], 128  }
  0x86   :  { %407 = vsyncadd [#allocation4], 4294967168 }
  0x87   :  { %298 = vsyncpa [#allocation3], 1 }
  0x88   :  { %299 = vsyncpa [#allocation6], 1 }
  0x89   :  { %300 = vsyncpa [#allocation4], 1 }

</bundles_post_ra>
